<compile_context>
chip_gen: v6e
topology: v6e:2x2x1
jax: 0.10.0
libtpu: 0.0.40
codegen_flags: <defaults>
</compile_context>

<pallas_src>
import functools

import jax
import jax.numpy as jnp
from jax.experimental import pallas as pl
from jax.experimental.pallas import tpu as pltpu


def _round_up(a: int, b: int) -> int:
    return (a + b - 1) // b * b


def _fc_bn_relu_dropout_kernel(x_ref, wt_ref, gamma_ref, beta_ref, u_ref,
                               o_ref, acc_ref, *, n_real: int, eps: float, drop_p: float):
    """Grid = (H tiles, K tiles). K (reduction) is the last, 'arbitrary' axis."""
    k = pl.program_id(1)

    # ---- init accumulator at the first K step ----
    @pl.when(k == 0)
    def _():
        acc_ref[...] = jnp.zeros_like(acc_ref)

    # ---- Linear (MXU): accumulate x_tile @ W^T_tile in f32 ----
    acc_ref[...] += jnp.dot(x_ref[...], wt_ref[...],
                            preferred_element_type=jnp.float32)

    # ---- epilogue at the last K step: BN (train) -> ReLU -> Dropout -> store ----
    @pl.when(k == pl.num_programs(1) - 1)
    def _():
        y = acc_ref[...]                       # (Np, tH) f32; padded rows are exactly 0
        inv_n = 1.0 / float(n_real)
        # One-pass batch statistics. Zero-padded batch rows contribute 0 to both sums
        # (no bias was added), so dividing by the real batch size gives exact stats.
        s1 = jnp.sum(y, axis=0, keepdims=True)
        s2 = jnp.sum(y * y, axis=0, keepdims=True)
        mean = s1 * inv_n
        var = jnp.maximum(s2 * inv_n - mean * mean, 0.0)   # biased var, matches torch training BN
        y = (y - mean) * jax.lax.rsqrt(var + eps)
        # gamma/beta already carry the 1/(1-p) dropout scale (folded in the wrapper).
        y = y * gamma_ref[...] + beta_ref[...]
        y = jnp.maximum(y, 0.0)                 # ReLU (VPU)
        if drop_p > 0.0:
            y = jnp.where(u_ref[...] >= drop_p, y, 0.0)    # inverted dropout (scale pre-folded)
        o_ref[...] = y.astype(o_ref.dtype)


def fc_bn_relu_dropout(x, weight, bias, gamma, beta, *, drop_p: float = 0.2,
                       eps: float = 1e-5, rng_key=None, dropout_uniform=None):
    """x: (N, D) f32; weight: (H, D) f32 (torch Linear layout); bias/gamma/beta: (H,) f32.

    `bias` is accepted for signature parity but is mathematically cancelled by training-mode
    BatchNorm mean-centering, so it is not sent to the kernel.
    """
    del bias  # exactly cancelled by BN mean-centering (training mode, no running stats emitted)

    N, D = x.shape
    H = weight.shape[0]
    drop_p = float(drop_p)
    assert 0.0 <= drop_p < 1.0

    Np = _round_up(N, 8)             # sublane alignment; padded rows are zero (see kernel comment)

    # --- tile selection (lane-dense, shrunk to a conservative VMEM budget incl. v7x 64 MiB) ---
    tH = min(512, _round_up(H, 128))
    tK = min(512, _round_up(D, 128))
    VMEM_BUDGET = 40 * 1024 * 1024   # double-buffered inputs + acc + double-buffered output

    def _vmem_bytes(tk, th):
        f32 = 4
        dbl_in = 2 * (Np * tk + tk * th + 2 * th + Np * th) * f32
        acc = Np * th * f32
        dbl_out = 2 * Np * th * f32
        return dbl_in + acc + dbl_out

    while _vmem_bytes(tK, tH) > VMEM_BUDGET and (tH > 128 or tK > 128):
        if tK >= tH and tK > 128:
            tK //= 2
        elif tH > 128:
            tH //= 2
        else:
            tK //= 2

    Hp = _round_up(H, tH)
    Kp = _round_up(D, tK)

    # --- pad operands (zero padding keeps the math exact: padded rows/cols contribute 0) ---
    xp = jnp.zeros((Np, Kp), jnp.float32).at[:N, :D].set(x.astype(jnp.float32))
    wtp = jnp.zeros((Kp, Hp), jnp.float32).at[:D, :H].set(
        jnp.transpose(weight).astype(jnp.float32))

    # Fold the inverted-dropout scale 1/(1-p) into the BN affine params (ReLU commutes with
    # a positive scale) so the kernel epilogue avoids an extra per-element multiply.
    inv_keep = 1.0 / (1.0 - drop_p) if drop_p > 0.0 else 1.0
    gp = jnp.ones((1, Hp), jnp.float32).at[0, :H].set(gamma.astype(jnp.float32) * inv_keep)
    bp = jnp.zeros((1, Hp), jnp.float32).at[0, :H].set(beta.astype(jnp.float32) * inv_keep)

    # Dropout uniforms: generated with jax.random (works on TPU and in interpret mode).
    if drop_p > 0.0:
        if dropout_uniform is None:
            if rng_key is None:
                rng_key = jax.random.PRNGKey(0)
            dropout_uniform = jax.random.uniform(rng_key, (N, H), dtype=jnp.float32)
        u = jnp.zeros((Np, Hp), jnp.float32).at[:N, :H].set(
            dropout_uniform.astype(jnp.float32))
    else:
        u = jnp.ones((Np, Hp), jnp.float32)

    grid = (Hp // tH, Kp // tK)

    kernel = functools.partial(_fc_bn_relu_dropout_kernel,
                               n_real=N, eps=float(eps), drop_p=drop_p)

    out_padded = pl.pallas_call(
        kernel,
        out_shape=jax.ShapeDtypeStruct((Np, Hp), jnp.float32),
        grid_spec=pltpu.PrefetchScalarGridSpec(
            num_scalar_prefetch=0,
            grid=grid,
            in_specs=[
                pl.BlockSpec((Np, tK), lambda h, k: (0, k)),   # x       (full batch, K tile)
                pl.BlockSpec((tK, tH), lambda h, k: (k, h)),   # W^T     (K tile, H tile)
                pl.BlockSpec((1, tH), lambda h, k: (0, h)),    # gamma'  (lane row vector)
                pl.BlockSpec((1, tH), lambda h, k: (0, h)),    # beta'
                pl.BlockSpec((Np, tH), lambda h, k: (0, h)),   # dropout uniforms
            ],
            out_specs=pl.BlockSpec((Np, tH), lambda h, k: (0, h)),
            scratch_shapes=[pltpu.VMEM((Np, tH), jnp.float32)],
        ),
        compiler_params=pltpu.CompilerParams(
            dimension_semantics=("parallel", "arbitrary"),
            vmem_limit_bytes=48 * 1024 * 1024,
        ),
    )(xp, wtp, gp, bp, u)

    return out_padded[:N, :H]


def _reference(x, weight, bias, gamma, beta, u, drop_p, eps):
    """Pure-JAX reference matching the torch module's training-mode forward."""
    y = x @ weight.T + bias
    mean = jnp.mean(y, axis=0, keepdims=True)
    var = jnp.mean((y - mean) ** 2, axis=0, keepdims=True)
    y = (y - mean) / jnp.sqrt(var + eps) * gamma + beta
    y = jnp.maximum(y, 0.0)
    if drop_p > 0.0:
        y = jnp.where(u >= drop_p, y / (1.0 - drop_p), 0.0)
    return y


if __name__ == "__main__":
    # Small shapes consistent with the module: batch=8, input_dim=32, hidden_dims=32.
    N, INPUT_DIM, HIDDEN = 8, 32, 32
    DROP_P = 0.2
    EPS = 1e-5

    key = jax.random.PRNGKey(0)
    kx, kw, ku = jax.random.split(key, 3)

    x = jax.random.normal(kx, (N, INPUT_DIM), dtype=jnp.float32)

    # Deterministic parameter init mirroring the module's _init_weights:
    #   xavier_uniform_ on linear.weight, zeros on linear.bias, BN weight=1, BN bias=0.
    bound = (6.0 / (INPUT_DIM + HIDDEN)) ** 0.5
    weight = jax.random.uniform(kw, (HIDDEN, INPUT_DIM), dtype=jnp.float32,
                                minval=-bound, maxval=bound)
    bias = jnp.zeros((HIDDEN,), dtype=jnp.float32)
    gamma = jnp.ones((HIDDEN,), dtype=jnp.float32)
    beta = jnp.zeros((HIDDEN,), dtype=jnp.float32)

    # Shared dropout uniforms so the kernel and the reference use the same mask.
    u = jax.random.uniform(ku, (N, HIDDEN), dtype=jnp.float32)

    out = fc_bn_relu_dropout(x, weight, bias, gamma, beta,
                             drop_p=DROP_P, eps=EPS, dropout_uniform=u)
    out = jax.block_until_ready(out)

    ref = _reference(x, weight, bias, gamma, beta, u, DROP_P, EPS)
    assert out.shape == (N, HIDDEN) and out.dtype == jnp.float32
    assert jnp.allclose(out, ref, atol=1e-3, rtol=1e-3), float(jnp.max(jnp.abs(out - ref)))
    print("KERNEL_OK")
</pallas_src>

<mosaic_0001>
module attributes {stable_mosaic.version = 11 : i64} {
  func.func @_fc_bn_relu_dropout_kernel(%arg0: i32, %arg1: i32, %arg2: memref<8x128xf32, #tpu.memory_space<vmem>>, %arg3: memref<128x128xf32, #tpu.memory_space<vmem>>, %arg4: memref<1x128xf32, #tpu.memory_space<vmem>>, %arg5: memref<1x128xf32, #tpu.memory_space<vmem>>, %arg6: memref<8x128xf32, #tpu.memory_space<vmem>>, %arg7: memref<8x128xf32, #tpu.memory_space<vmem>>, %arg8: memref<8x128xf32, #tpu.memory_space<vmem>>) attributes {dimension_semantics = [#tpu.dimension_semantics<parallel>, #tpu.dimension_semantics<arbitrary>], iteration_bounds = array<i64: 1, 1>, scalar_prefetch = 0 : i64, scratch_operands = 1 : i64, tpu.core_type = #tpu.core_type<tc>, window_params = [{transform_indices = @transform_0, window_bounds = array<i64: 8, 128>}, {transform_indices = @transform_1, window_bounds = array<i64: 128, 128>}, {transform_indices = @transform_2, window_bounds = array<i64: 1, 128>}, {transform_indices = @transform_3, window_bounds = array<i64: 1, 128>}, {transform_indices = @transform_4, window_bounds = array<i64: 8, 128>}, {transform_indices = @transform_5, window_bounds = array<i64: 8, 128>}]} {
    %c0_i32 = arith.constant 0 : i32
    %0 = arith.cmpi eq, %arg1, %c0_i32 : i32
    %1 = arith.extui %0 : i1 to i32
    %c0_i32_0 = arith.constant 0 : i32
    %2 = arith.cmpi ne, %1, %c0_i32_0 : i32
    scf.if %2 {
      %cst_10 = arith.constant 0.000000e+00 : f32
      %12 = vector.broadcast %cst_10 : f32 to vector<8x128xf32>
      %c0_11 = arith.constant 0 : index
      %c0_12 = arith.constant 0 : index
      %13 = vector.load %arg8[%c0_11, %c0_12] : memref<8x128xf32, #tpu.memory_space<vmem>>, vector<8x128xf32>
      tpu.vector_store %arg8[%c0_11, %c0_12], %12 {strides = array<i32>} : memref<8x128xf32, #tpu.memory_space<vmem>>, vector<8x128xf32>,
    } else {
    }
    %c0 = arith.constant 0 : index
    %c0_1 = arith.constant 0 : index
    %3 = vector.load %arg8[%c0, %c0_1] : memref<8x128xf32, #tpu.memory_space<vmem>>, vector<8x128xf32>
    %c0_2 = arith.constant 0 : index
    %c0_3 = arith.constant 0 : index
    %4 = vector.load %arg2[%c0_2, %c0_3] : memref<8x128xf32, #tpu.memory_space<vmem>>, vector<8x128xf32>
    %c0_4 = arith.constant 0 : index
    %c0_5 = arith.constant 0 : index
    %5 = vector.load %arg3[%c0_4, %c0_5] : memref<128x128xf32, #tpu.memory_space<vmem>>, vector<128x128xf32>
    %cst = arith.constant dense<0.000000e+00> : vector<8x128xf32>
    %6 = tpu.matmul %4, %5, %cst {dimension_numbers = #tpu.dot_dimension_numbers<[1], [0], [0], [1], [0, 0, 1, 1], [], []>} : vector<8x128xf32>, vector<128x128xf32>, vector<8x128xf32> -> vector<8x128xf32>
    %7 = arith.addf %3, %6 : vector<8x128xf32>
    %c0_6 = arith.constant 0 : index
    %c0_7 = arith.constant 0 : index
    %8 = vector.load %arg8[%c0_6, %c0_7] : memref<8x128xf32, #tpu.memory_space<vmem>>, vector<8x128xf32>
    tpu.vector_store %arg8[%c0_6, %c0_7], %7 {strides = array<i32>} : memref<8x128xf32, #tpu.memory_space<vmem>>, vector<8x128xf32>,
    %c0_i32_8 = arith.constant 0 : i32
    %9 = arith.cmpi eq, %arg1, %c0_i32_8 : i32
    %10 = arith.extui %9 : i1 to i32
    %c0_i32_9 = arith.constant 0 : i32
    %11 = arith.cmpi ne, %10, %c0_i32_9 : i32
    scf.if %11 {
      %c0_10 = arith.constant 0 : index
      %c0_11 = arith.constant 0 : index
      %12 = vector.load %arg8[%c0_10, %c0_11] : memref<8x128xf32, #tpu.memory_space<vmem>>, vector<8x128xf32>
      %cst_12 = arith.constant dense<0.000000e+00> : vector<128xf32>
      %13 = vector.multi_reduction <add>, %12, %cst_12 [0] : vector<8x128xf32> to vector<128xf32>
      %14 = vector.shape_cast %13 : vector<128xf32> to vector<1x128xf32>
      %15 = arith.mulf %12, %12 : vector<8x128xf32>
      %cst_13 = arith.constant dense<0.000000e+00> : vector<128xf32>
      %16 = vector.multi_reduction <add>, %15, %cst_13 [0] : vector<8x128xf32> to vector<128xf32>
      %17 = vector.shape_cast %16 : vector<128xf32> to vector<1x128xf32>
      %cst_14 = arith.constant 1.250000e-01 : f32
      %18 = vector.broadcast %cst_14 : f32 to vector<1x128xf32>
      %19 = arith.mulf %14, %18 : vector<1x128xf32>
      %cst_15 = arith.constant 1.250000e-01 : f32
      %20 = vector.broadcast %cst_15 : f32 to vector<1x128xf32>
      %21 = arith.mulf %17, %20 : vector<1x128xf32>
      %22 = arith.mulf %19, %19 : vector<1x128xf32>
      %23 = arith.subf %21, %22 : vector<1x128xf32>
      %cst_16 = arith.constant 0.000000e+00 : f32
      %24 = vector.broadcast %cst_16 : f32 to vector<1x128xf32>
      %25 = arith.maximumf %23, %24 : vector<1x128xf32>
      %26 = vector.broadcast %19 : vector<1x128xf32> to vector<8x128xf32>
      %27 = arith.subf %12, %26 : vector<8x128xf32>
      %cst_17 = arith.constant 9.99999974E-6 : f32
      %28 = vector.broadcast %cst_17 : f32 to vector<1x128xf32>
      %29 = arith.addf %25, %28 : vector<1x128xf32>
      %30 = math.rsqrt %29 : vector<1x128xf32>
      %31 = vector.broadcast %30 : vector<1x128xf32> to vector<8x128xf32>
      %32 = arith.mulf %27, %31 : vector<8x128xf32>
      %c0_18 = arith.constant 0 : index
      %c0_19 = arith.constant 0 : index
      %33 = vector.load %arg4[%c0_18, %c0_19] : memref<1x128xf32, #tpu.memory_space<vmem>>, vector<1x128xf32>
      %34 = vector.broadcast %33 : vector<1x128xf32> to vector<8x128xf32>
      %35 = arith.mulf %32, %34 : vector<8x128xf32>
      %c0_20 = arith.constant 0 : index
      %c0_21 = arith.constant 0 : index
      %36 = vector.load %arg5[%c0_20, %c0_21] : memref<1x128xf32, #tpu.memory_space<vmem>>, vector<1x128xf32>
      %37 = vector.broadcast %36 : vector<1x128xf32> to vector<8x128xf32>
      %38 = arith.addf %35, %37 : vector<8x128xf32>
      %cst_22 = arith.constant 0.000000e+00 : f32
      %39 = vector.broadcast %cst_22 : f32 to vector<8x128xf32>
      %40 = arith.maximumf %38, %39 : vector<8x128xf32>
      %c0_23 = arith.constant 0 : index
      %c0_24 = arith.constant 0 : index
      %41 = vector.load %arg6[%c0_23, %c0_24] : memref<8x128xf32, #tpu.memory_space<vmem>>, vector<8x128xf32>
      %cst_25 = arith.constant 2.000000e-01 : f32
      %42 = vector.broadcast %cst_25 : f32 to vector<8x128xf32>
      %43 = arith.cmpf oge, %41, %42 : vector<8x128xf32>
      %cst_26 = arith.constant 0.000000e+00 : f32
      %44 = vector.broadcast %cst_26 : f32 to vector<8x128xf32>
      %45 = arith.select %43, %40, %44 : vector<8x128xi1>, vector<8x128xf32>
      %c0_27 = arith.constant 0 : index
      %c0_28 = arith.constant 0 : index
      %46 = vector.load %arg7[%c0_27, %c0_28] : memref<8x128xf32, #tpu.memory_space<vmem>>, vector<8x128xf32>
      tpu.vector_store %arg7[%c0_27, %c0_28], %45 {strides = array<i32>} : memref<8x128xf32, #tpu.memory_space<vmem>>, vector<8x128xf32>,
    } else {
    }
    return
  }
  func.func @transform_0(%arg0: i32, %arg1: i32) -> (i32, i32) {
    %c0_i32 = arith.constant 0 : i32
    %c0_i32_0 = arith.constant 0 : i32
    return %c0_i32, %arg1 : i32, i32
  }
  func.func @transform_1(%arg0: i32, %arg1: i32) -> (i32, i32) {
    %c0_i32 = arith.constant 0 : i32
    return %arg1, %arg0 : i32, i32
  }
  func.func @transform_2(%arg0: i32, %arg1: i32) -> (i32, i32) {
    %c0_i32 = arith.constant 0 : i32
    %c0_i32_0 = arith.constant 0 : i32
    return %c0_i32, %arg0 : i32, i32
  }
  func.func @transform_3(%arg0: i32, %arg1: i32) -> (i32, i32) {
    %c0_i32 = arith.constant 0 : i32
    %c0_i32_0 = arith.constant 0 : i32
    return %c0_i32, %arg0 : i32, i32
  }
  func.func @transform_4(%arg0: i32, %arg1: i32) -> (i32, i32) {
    %c0_i32 = arith.constant 0 : i32
    %c0_i32_0 = arith.constant 0 : i32
    return %c0_i32, %arg0 : i32, i32
  }
  func.func @transform_5(%arg0: i32, %arg1: i32) -> (i32, i32) {
    %c0_i32 = arith.constant 0 : i32
    %c0_i32_0 = arith.constant 0 : i32
    return %c0_i32, %arg0 : i32, i32
  }
}

</mosaic_0001>

<bundles_post_ra>
// kernel: tpu_custom_call.1
= control target key start
LH: loop header
LB: loop body
LE: loop exit
PB: predicated region body
PF: predicated region fallthrough
CT: control target
= control target key end

     0   :  { %10 = vsyncpa [#allocation4], 0  ;;  %s422_s0 = inlined_call_operand.hbm [shape: f32[8,128], index: 0, kind: input, shape index: {}]   ;;  %s423_s1 = inlined_call_operand.hbm [shape: f32[128,128], index: 1, kind: input, shape index: {}]   ;;  %s424_s2 = inlined_call_operand.vmem [shape: f32[1,128], index: 2, kind: input, shape index: {}]   ;;  %s425_s3 = inlined_call_operand.vmem [shape: f32[1,128], index: 3, kind: input, shape index: {}]   ;;  %s426_s4 = inlined_call_operand.hbm [shape: f32[8,128], index: 4, kind: input, shape index: {}]   ;;  %s427_s5 = inlined_call_operand.hbm [shape: f32[8,128], index: 5, kind: output, shape index: {}]  }
   0x1   :  { %11 = vsyncpa [#allocation7], 0 }
   0x2   :  { %12 = vsyncpa [#allocation5], 0  ;;  %s366_s18 = smov [#allocation6]  }
   0x3   :  { %s28_s19 = sshll.u32 %s366_s18, 4  ;;  %s29_s19 = int_to_ptr.vmem [resolvable:$true] %s28_s19 }
   0x4   :  { %s288_s20 = scalar_lea.vmem %s29_s19, 2048  ;;  %p293_p1 = scmp.lt.s32.totalorder %s29_s19, %s29_s19 }
   0x5   :  { %p289_p0 = scmp.ne.s32.totalorder %s29_s19, %s288_s20  ;;  %p294_p2 = scmp.lt.s32.totalorder %s288_s20, %s288_s20 }
   0x7   :  { %p295_p3 = por %p294_p2, %p293_p1 }
   0x9   :  { %p296_p4 = pnand %p295_p3, %p289_p0 }
   0xb   :  { %299 = shalt.err (!%p296_p4)
}
   0xc   :  { %s367_s21 = smov 128   ;;  %s368_s22 = smov 8  }
   0xd   :  { %34 = dma.hbm_to_vmem [thread:$0]  %s423_s1, 2048, %s29_s19, [#allocation7], %s367_s21, %s367_s21, %s368_s22  }
   0xe   :  { %s369_s25 = smov [#allocation3]   ;;  %s370_s27 = smov [#allocation8]  }
   0xf   :  { %s19_s26 = sshll.u32 %s369_s25, 4  ;;  %s45_s28 = sshll.u32 %s370_s27, 4  ;;  %s20_s26 = int_to_ptr.vmem [resolvable:$true] %s19_s26  ;;  %s46_s28 = int_to_ptr.vmem [resolvable:$true] %s45_s28 }
  0x10   :  { %s308_s29 = scalar_lea.vmem %s20_s26, 128  ;;  %p313_p6 = scmp.lt.s32.totalorder %s20_s26, %s20_s26 }
  0x11   :  { %p309_p5 = scmp.ne.s32.totalorder %s20_s26, %s308_s29  ;;  %p314_p7 = scmp.lt.s32.totalorder %s308_s29, %s308_s29 }
  0x13   :  { %p315_p8 = por %p314_p7, %p313_p6 }
  0x15   :  { %p316_p9 = pnand %p315_p8, %p309_p5 }
  0x17   :  { %319 = shalt.err (!%p316_p9)
}
  0x18   :  { %22 = dma.hbm_to_vmem [thread:$0]  %s422_s0, 128, %s20_s26, [#allocation4]  }
  0x19   :  { %s328_s7 = scalar_lea.vmem %s46_s28, 128  ;;  %p333_p11 = scmp.lt.s32.totalorder %s46_s28, %s46_s28 }
  0x1a   :  { %p329_p10 = scmp.ne.s32.totalorder %s46_s28, %s328_s7  ;;  %p334_p12 = scmp.lt.s32.totalorder %s328_s7, %s328_s7 }
  0x1c   :  { %p335_p13 = por %p334_p12, %p333_p11 }
  0x1e   :  { %p336_p0 = pnand %p335_p13, %p329_p10 }
  0x20   :  { %339 = shalt.err (!%p336_p0)
}
  0x21   :  { %48 = dma.hbm_to_vmem [thread:$0]  %s426_s4, 128, %s46_s28, [#allocation7]  }
  0x22   :  { %360 = dma.done.wait [#allocation4], 128  }
  0x23   :  { %361 = vsyncadd [#allocation4], 4294967168 }
  0x24   :  { %362 = dma.done.wait [#allocation7], 2176  }
  0x25   :  { %363 = vsyncadd [#allocation7], 4294965120  ;;  %v371_v0 = vmov 0.0   ;;  %vm372_vm0 = vmmov 0   ;;  %v80_v1 = vld [vmem:[#allocation6 + $0x78] sm:$0xff]  ;;  %v79_v2 = vld [vmem:[#allocation6 + $0x70] sm:$0xff] }
  0x26   :  { %235 = vmatprep.subr.mxu0 %v371_v0  ;;  %267 = vmatprep.mubr.msk.f32.mxu0 %vm372_vm0, %v371_v0  ;;  %v78_v3 = vld [vmem:[#allocation6 + $0x68] sm:$0xff]  ;;  %v77_v4 = vld [vmem:[#allocation6 + $0x60] sm:$0xff]  ;;  %v76_v5 = vld [vmem:[#allocation6 + $0x58] sm:$0xff]  ;;  %s373_s11 = smov [#allocation9]  }
  0x27   :  { %236 = vmatpush3.msra.mxu0 %v80_v1  ;;  %v75_v6 = vld [vmem:[#allocation6 + $0x50] sm:$0xff]  ;;  %v74_v7 = vld [vmem:[#allocation6 + $0x48] sm:$0xff]  ;;  %v73_v8 = vld [vmem:[#allocation6 + $0x40] sm:$0xff]  ;;  %s206_s12 = sshll.u32 %s373_s11, 4  ;;  %s207_s12 = int_to_ptr.vmem [resolvable:$true] %s206_s12 }
  0x28   :  { %237 = vmatprep.subr.mxu0 %v371_v0  ;;  %v72_v9 = vld [vmem:[#allocation6 + $0x38] sm:$0xff]  ;;  %v71_v10 = vld [vmem:[#allocation6 + $0x30] sm:$0xff]  ;;  %v70_v11 = vld [vmem:[#allocation6 + $0x28] sm:$0xff]  ;;  %s340_s13 = scalar_lea.vmem %s207_s12, 128  ;;  %p345_p2 = scmp.lt.s32.totalorder %s207_s12, %s207_s12 }
  0x29   :  { %238 = vmatpush3.msra.mxu0 %v79_v2  ;;  %v69_v12 = vld [vmem:[#allocation6 + $0x20] sm:$0xff]  ;;  %v68_v13 = vld [vmem:[#allocation6 + $0x18] sm:$0xff]  ;;  %v67_v14 = vld [vmem:[#allocation6 + $0x10] sm:$0xff]  ;;  %p341_p1 = scmp.ne.s32.totalorder %s207_s12, %s340_s13  ;;  %p346_p3 = scmp.lt.s32.totalorder %s340_s13, %s340_s13 }
  0x2a   :  { %239 = vmatprep.subr.mxu0 %v371_v0  ;;  %v66_v15 = vld [vmem:[#allocation6 + $0x8] sm:$0xff]  ;;  %v65_v16 = vld [vmem:[#allocation6] sm:$0xff]  ;;  %v64_v17 = vld [vmem:[#allocation3] sm:$0xff] }
  0x2b   :  { %240 = vmatpush3.msra.mxu0 %v78_v3  ;;  %v216_v41 = vld [vmem:[%s424_s2] ss:$0 sm:$0xff]  ;;  %v196_v45 = vld [vmem:[#allocation8] sm:$0xff]  ;;  %p347_p4 = por %p346_p3, %p345_p2 }
  0x2c   :  { %241 = vmatprep.subr.mxu0 %v371_v0  ;;  %v217_v43 = vld [vmem:[%s425_s3] ss:$0 sm:$0xff]  ;;  %vm197_vm1 = vcmp.ge.f32.partialorder %v196_v45, 0.2 }
  0x2d   :  { %242 = vmatpush3.msra.mxu0 %v77_v4  ;;  %p348_p5 = pnand %p347_p4, %p341_p1 }
  0x2e   :  { %243 = vmatprep.subr.mxu0 %v371_v0 }
  0x2f   :  { %244 = vmatpush3.msra.mxu0 %v76_v5 }
  0x30   :  { %245 = vmatprep.subr.mxu0 %v371_v0 }
  0x31   :  { %246 = vmatpush3.msra.mxu0 %v75_v6 }
  0x32   :  { %247 = vmatprep.subr.mxu0 %v371_v0 }
  0x33   :  { %248 = vmatpush3.msra.mxu0 %v74_v7 }
  0x34   :  { %249 = vmatprep.subr.mxu0 %v371_v0 }
  0x35   :  { %250 = vmatpush3.msra.mxu0 %v73_v8 }
  0x36   :  { %251 = vmatprep.subr.mxu0 %v371_v0 }
  0x37   :  { %252 = vmatpush3.msra.mxu0 %v72_v9 }
  0x38   :  { %253 = vmatprep.subr.mxu0 %v371_v0 }
  0x39   :  { %254 = vmatpush3.msra.mxu0 %v71_v10 }
  0x3a   :  { %255 = vmatprep.subr.mxu0 %v371_v0 }
  0x3b   :  { %256 = vmatpush3.msra.mxu0 %v70_v11 }
  0x3c   :  { %257 = vmatprep.subr.mxu0 %v371_v0 }
  0x3d   :  { %258 = vmatpush3.msra.mxu0 %v69_v12 }
  0x3e   :  { %259 = vmatprep.subr.mxu0 %v371_v0 }
  0x3f   :  { %260 = vmatpush3.msra.mxu0 %v68_v13 }
  0x40   :  { %261 = vmatprep.subr.mxu0 %v371_v0 }
  0x41   :  { %262 = vmatpush3.msra.mxu0 %v67_v14 }
  0x42   :  { %263 = vmatprep.subr.mxu0 %v371_v0 }
  0x43   :  { %264 = vmatpush3.msra.mxu0 %v66_v15 }
  0x44   :  { %265 = vmatprep.subr.mxu0 %v371_v0 }
  0x45   :  { %266 = vmatpush3.msra.mxu0 %v65_v16 }
  0x46   :  { %268 = vmatmul.mubr.f32.vlgmr.msra.gmra.mxu0 %v64_v17 }
 0x106   :  { %v147_v18 = vpop.f32.mrf.mxu0 }
 0x107   :  { %v157_v19 = vrot.slane %v147_v18, 4  ;;  %v163_v20 = vmul.f32 %v147_v18, %v147_v18 }
 0x108   :  { %v269_v21 = vpop.f32.mrf.mxu0 }
 0x109   :  { %v158_v22 = vadd.f32 %v157_v19, %v147_v18  ;;  %v164_v23 = vrot.slane %v163_v20, 4 }
 0x10b   :  { %v159_v24 = vrot.slane %v158_v22, 2  ;;  %v165_v25 = vadd.f32 %v164_v23, %v163_v20 }
 0x10d   :  { %v160_v26 = vadd.f32 %v159_v24, %v158_v22  ;;  %v166_v27 = vrot.slane %v165_v25, 2 }
 0x10f   :  { %v161_v28 = vrot.slane %v160_v26, 1  ;;  %v167_v29 = vadd.f32 %v166_v27, %v165_v25 }
 0x111   :  { %v162_v30 = vadd.f32 %v161_v28, %v160_v26  ;;  %v168_v31 = vrot.slane %v167_v29, 1 }
 0x113   :  { %v169_v32 = vadd.f32 %v168_v31, %v167_v29  ;;  %v170_v33 = vmul.f32 0.125, %v162_v30 }
 0x115   :  { %v171_v34 = vmul.f32 0.125, %v169_v32  ;;  %v172_v35 = vmul.f32 %v170_v33, %v170_v33  ;;  %v175_v39 = vsub.f32 %v147_v18, %v170_v33 }
 0x117   :  { %v173_v36 = vsub.f32 %v171_v34, %v172_v35 }
 0x119   :  { %v174_v37 = vmax.f32 %v173_v36, 0.0 }
 0x11b   :  { %v176_v38 = vadd.f32 1e-05, %v174_v37 }
 0x11d   :  { %278 = vrsqrt.f32 %v176_v38 }
 0x12a   :  { %v279_v40 = vpop.eup %278 }
 0x12b   :  { %v178_v42 = vmul.f32 %v279_v40, %v175_v39 }
 0x12d   :  { %v186_v44 = vmul.f32 %v216_v41, %v178_v42 }
 0x12f   :  { %v194_v46 = vadd.f32 %v217_v43, %v186_v44 }
 0x131   :  { %v195_v47 = vmax.f32 %v194_v46, 0.0 }
 0x133   :  { %v198_v48 = vsel %vm197_vm1, %v195_v47, 0.0 }
 0x134   :  { %199 = vst [vmem:[#allocation9] sm:$0xff] %v198_v48 }
 0x135   :  { %351 = shalt.err (!%p348_p5)
}
 0x136   :  { %209 = dma.vmem_to_hbm [thread:$0]  %s207_s12, 128, %s427_s5, [#allocation5]  }
 0x137   :  { %364 = dma.done.wait [#allocation5], 128  }
 0x138   :  { %365 = vsyncadd [#allocation5], 4294967168 }
 0x139   :  { %213 = vsyncpa [#allocation4], 1 }
 0x13a   :  { %214 = vsyncpa [#allocation7], 1 }
 0x13b   :  { %215 = vsyncpa [#allocation5], 1 }

</bundles_post_ra>
